<compile_context>
chip_gen: v7x
topology: tpu7x:2x2x1
jax: 0.10.0
libtpu: 0.0.40
codegen_flags: <defaults>
</compile_context>

<pallas_src>
import math
import numpy as np
import jax
import jax.numpy as jnp
from jax.experimental import pallas as pl
from jax.experimental.pallas import tpu as pltpu


def _round_up(x, m):
    return ((x + m - 1) // m) * m


def _tpu_config():
    """Generation-aware knobs: (#cores to shard over, VMEM budget, N-tile cap, is_v7)."""
    kind = ""
    try:
        kind = jax.devices()[0].device_kind.lower()
    except Exception:
        pass
    is_v7 = "v7" in kind
    if is_v7:
        # v7x: 2 TensorCores per chip, but only 64 MiB VMEM per TC.
        return 2, 48 * 1024 * 1024, 1024, True
    # v5e / v6e: 1 TensorCore, 128 MiB physical VMEM -> larger N tiles amortize
    # the ~0.35 us per-grid-step overhead and DMA issue cost.
    return 1, 64 * 1024 * 1024, 2048, False


def _pick_tn(n, mp, mprow, d_pad, vmem_budget, max_tn):
    """Largest lane-dense N tile whose working set fits the VMEM budget."""
    tn = min(max_tn, _round_up(max(n, 1), 128))
    # Residents use constant index maps; Pallas still allocates 2 buffers each.
    # (On v7x with very large M, pipeline_mode=pl.Buffered(1) would halve this.)
    resident = 4 * 2 * (mp * d_pad + mp * 128 + mp * mp + mprow * mp)
    while tn > 128:
        stream = 4 * 2 * (d_pad + 8) * tn        # xs_t + side tiles, double-buffered
        interm = 4 * tn * (2 * mp + mprow + 8)   # kuf, A, SA, accumulator
        if resident + stream + interm <= int(0.55 * vmem_budget):
            break
        tn -= 128
    return max(tn, 128)


# ----------------------------- Pallas kernels -----------------------------

def _kuu_kernel(zs_ref, zsqc_ref, zsqr_ref, scal_ref, out_ref):
    """K(Z,Z): ARD squared-exponential on pre-scaled Z with precomputed norms."""
    zs = zs_ref[...]
    cross = jax.lax.dot_general(zs, zs, (((1,), (1,)), ((), ())),
                                preferred_element_type=jnp.float32)
    sq = jnp.maximum(zsqc_ref[...] + zsqr_ref[...] - 2.0 * cross, 0.0)
    out_ref[...] = scal_ref[0] * jnp.exp(-0.5 * sq)


def _make_fused_kernel(mp, mprow, fm_row):
    """Fused Kuf -> A = Linv @ Kuf -> SA = S_aug @ A -> partial ELBO sum.

    Grid: (cores, N tiles per core). Per-tile inputs (tiled over N, lane-dense):
      xst_ref  (d_pad, TN)  scaled X tile, transposed
      side_ref (8, TN)      row 0: 0.5*||x||^2, row 1: y, row 2: weight*(-0.5/noise_var)
    Grid-invariant residents:
      zs_ref (mp, d_pad), zsqh_ref (mp, 1) = 0.5*||z||^2 - log kvar,
      linv_ref (mp, mp) = L^{-1}, saug_ref (mprow, mp) = [q_tril q_tril^T - I ; q_mu^T]
    scal_ref (1,) SMEM: [log kernel variance]
    out_ref  (8, 128) per-core partial-sum block;  acc_ref (1, TN) VMEM scratch.
    """
    slice_needed = mprow != mp

    def kernel(scal_ref, xst_ref, side_ref, zs_ref, zsqh_ref, linv_ref, saug_ref,
               out_ref, acc_ref):
        j = pl.program_id(1)

        @pl.when(j == 0)
        def _init():
            acc_ref[...] = jnp.zeros_like(acc_ref)

        logkvar = scal_ref[0]

        # ---- Kuf tile: RBF(Z, X_tile) with all constants pre-folded ----
        cross = jnp.dot(zs_ref[...], xst_ref[...],
                        preferred_element_type=jnp.float32)          # (mp, TN)
        arg = cross - zsqh_ref[...] - side_ref[0:1, :]
        kuf = jnp.exp(jnp.minimum(arg, logkvar))                      # (mp, TN)

        # ---- A = L^{-1} Kuf ;  SA = S_aug @ A (fmean row + fvar term) ----
        A = jnp.dot(linv_ref[...], kuf, preferred_element_type=jnp.float32)
        SA = jnp.dot(saug_ref[...], A, preferred_element_type=jnp.float32)

        fmean = SA[fm_row:fm_row + 1, :]                              # (1, TN)
        SA_m = SA[:mp, :] if slice_needed else SA
        fvar_res = jnp.sum(A * SA_m, axis=0, keepdims=True)           # fvar - kvar

        # ---- lane-wise accumulation (cross-lane reduce deferred to finalize) ----
        diff = side_ref[1:2, :] - fmean
        acc_ref[...] += side_ref[2:3, :] * (diff * diff + fvar_res)

        @pl.when(j == pl.num_programs(1) - 1)
        def _finalize():
            s = jnp.sum(acc_ref[...], axis=1, keepdims=True)          # (1, 1)
            out_ref[...] = jnp.broadcast_to(s, out_ref.shape)

    return kernel


# ------------------------------ JAX wrapper --------------------------------

def svgp_neg_elbo(X, Y, *, Z, lengthscale, variance, noise_var, q_mu, q_sqrt,
                  num_obs, jitter=1e-6):
    n, d = X.shape
    m = Z.shape[0]

    num_cores, vmem_budget, max_tn, is_v7 = _tpu_config()

    xs = (X / lengthscale).astype(jnp.float32)          # (N, D)
    zs = (Z / lengthscale).astype(jnp.float32)          # (M, D)
    zsq_c = jnp.sum(zs * zs, axis=1, keepdims=True)     # (M, 1)

    kvar = jnp.asarray(variance, jnp.float32)
    nv = jnp.asarray(noise_var, jnp.float32)
    inv_nv = 1.0 / nv
    logkvar = jnp.log(kvar)

    # ---- K(Z,Z) (small, single block) ----
    kuu = pl.pallas_call(
        _kuu_kernel,
        out_shape=jax.ShapeDtypeStruct((m, m), jnp.float32),
        in_specs=[
            pl.BlockSpec(memory_space=pltpu.MemorySpace.VMEM),
            pl.BlockSpec(memory_space=pltpu.MemorySpace.VMEM),
            pl.BlockSpec(memory_space=pltpu.MemorySpace.VMEM),
            pl.BlockSpec(memory_space=pltpu.MemorySpace.SMEM),
        ],
        out_specs=pl.BlockSpec(memory_space=pltpu.MemorySpace.VMEM),
    )(zs, zsq_c, zsq_c.reshape(1, m), kvar.reshape(1))

    # TODO(synk): the exception-driven jitter-escalation retry in cholesky(safe=True)
    # has no JAX/Pallas equivalent; a fixed jitter is used. Cholesky / triangular
    # inverse are sequential and stay in plain JAX (M x M, cheap).  Using an
    # explicit L^{-1} (vs triangular solve of Kuf) is slightly less stable for
    # ill-conditioned Kuu; acceptable with jitter.
    L = jnp.linalg.cholesky(kuu + jitter * jnp.eye(m, dtype=jnp.float32))
    linv = jax.scipy.linalg.solve_triangular(L, jnp.eye(m, dtype=jnp.float32),
                                             lower=True)

    # ---- N-independent work hoisted out of the hot loop ----
    qmu32 = q_mu.astype(jnp.float32)
    qs32 = q_sqrt.astype(jnp.float32)
    q_tril = jnp.tril(qs32)
    kl = 0.5 * (jnp.sum(qmu32 ** 2) - jnp.float32(m)
                - jnp.sum(jnp.log(jnp.diag(qs32) ** 2)) + jnp.sum(q_tril ** 2))

    # ---- padding / tiling geometry ----
    d_pad = _round_up(d, 8)                    # sublane-aligned feature dim
    mp = _round_up(m, 128)                     # lane-aligned inducing dim (MXU-native)
    mprow = mp if m < mp else mp + 8           # room for the fmean (q_mu) row
    fm_row = m

    tn = _pick_tn(n, mp, mprow, d_pad, vmem_budget, max_tn)
    n_pad = _round_up(n, num_cores * tn)
    tiles_per_core = n_pad // (num_cores * tn)

    # ---- streamed operands: lane-dense X^T tile + packed side-band ----
    scale = jnp.float32(num_obs) / jnp.float32(n)
    xs_t = jnp.zeros((d_pad, n_pad), jnp.float32).at[:d, :n].set(xs.T)
    side = jnp.zeros((8, n_pad), jnp.float32)
    side = side.at[0, :n].set(0.5 * jnp.sum(xs * xs, axis=1))       # 0.5*||x||^2
    side = side.at[1, :n].set(Y.reshape(-1).astype(jnp.float32))    # targets
    side = side.at[2, :n].set(-0.5 * inv_nv * scale)                # weight (0 on pad)

    # ---- grid-invariant residents (zero padding annihilates padded kuf rows) ----
    def pad2(a, r, c):
        return jnp.pad(a, ((0, r - a.shape[0]), (0, c - a.shape[1])))

    zs_p = pad2(zs, mp, d_pad)
    zsqh_p = pad2(0.5 * zsq_c - logkvar, mp, 1)
    linv_p = pad2(linv, mp, mp)
    saug = jnp.zeros((mprow, mp), jnp.float32)
    saug = saug.at[:m, :m].set(q_tril @ q_tril.T - jnp.eye(m, dtype=jnp.float32))
    saug = saug.at[fm_row, :m].set(qmu32[:, 0])

    scal = logkvar.reshape(1)

    cost = pl.CostEstimate(
        flops=int(2 * n_pad * mp * (d_pad + mp + mprow) + 8 * n_pad * mp),
        transcendentals=int(mp * n_pad),
        bytes_accessed=int(4 * (n_pad * (d_pad + 8) + mp * (d_pad + 1 + mp)
                                + mprow * mp + num_cores * 8 * 128)))

    blk_n = lambda p, j: (0, p * tiles_per_core + j)
    const_map = lambda p, j: (0, 0)
    if num_cores > 1:
        dim_sem = (pltpu.CORE_PARALLEL, pltpu.ARBITRARY)   # real sharding on v7x
    else:
        dim_sem = ("arbitrary", "arbitrary")

    out = pl.pallas_call(
        _make_fused_kernel(mp, mprow, fm_row),
        out_shape=jax.ShapeDtypeStruct((num_cores * 8, 128), jnp.float32),
        grid_spec=pltpu.PrefetchScalarGridSpec(
            num_scalar_prefetch=0,
            grid=(num_cores, tiles_per_core),
            in_specs=[
                pl.BlockSpec(memory_space=pltpu.MemorySpace.SMEM),   # scal
                pl.BlockSpec((d_pad, tn), blk_n),                    # X^T tile
                pl.BlockSpec((8, tn), blk_n),                        # side-band
                pl.BlockSpec((mp, d_pad), const_map),                # zs
                pl.BlockSpec((mp, 1), const_map),                    # zsqh
                pl.BlockSpec((mp, mp), const_map),                   # linv
                pl.BlockSpec((mprow, mp), const_map),                # S_aug
            ],
            out_specs=pl.BlockSpec((8, 128), lambda p, j: (p, 0)),
            scratch_shapes=[pltpu.VMEM((1, tn), jnp.float32)],
        ),
        compiler_params=pltpu.CompilerParams(
            dimension_semantics=dim_sem,
            vmem_limit_bytes=vmem_budget),
        cost_estimate=cost,
    )(scal, xs_t, side, zs_p, zsqh_p, linv_p, saug)

    kernel_sum = jnp.sum(out.reshape(num_cores, 8, 128)[:, 0, 0])
    # Per-point constants folded out of the kernel:
    c0 = jnp.log(2.0 * jnp.pi) + jnp.log(nv)
    const0 = -0.5 * scale * jnp.float32(n) * (c0 + kvar * inv_nv)
    return kl - const0 - kernel_sum                      # -(sum*scale - KL)


# --------------------------- pure-JAX reference ----------------------------

def ref_neg_elbo(X, Y, *, Z, lengthscale, variance, noise_var, q_mu, q_sqrt,
                 num_obs, jitter=1e-6):
    def k(a, b):
        a = a / lengthscale
        b = b / lengthscale
        sq = (jnp.sum(a * a, 1)[:, None] + jnp.sum(b * b, 1)[None, :]
              - 2.0 * a @ b.T)
        return variance * jnp.exp(-0.5 * jnp.maximum(sq, 0.0))

    n, m = X.shape[0], Z.shape[0]
    kdiag = variance * jnp.ones((n,), jnp.float32)
    kuu = k(Z, Z)
    kuf = k(X, Z)
    L = jnp.linalg.cholesky(kuu + jitter * jnp.eye(m, dtype=kuu.dtype))
    A = jax.scipy.linalg.solve_triangular(L, kuf.T, lower=True)
    fvar = kdiag - jnp.sum(A ** 2, axis=0)
    fmean = (A.T @ q_mu).reshape(-1)
    q_tril = jnp.tril(q_sqrt)
    fvar = fvar + jnp.sum((q_tril.T @ A) ** 2, axis=0)
    var_exp = -0.5 * (jnp.log(2.0 * jnp.pi) + jnp.log(noise_var)
                      + ((Y.reshape(-1) - fmean) ** 2 + fvar) / noise_var)
    kl = 0.5 * (jnp.sum(q_mu ** 2) - m
                - jnp.sum(jnp.log(jnp.diag(q_sqrt) ** 2)) + jnp.sum(q_tril ** 2))
    scale = num_obs / n
    return -(jnp.sum(var_exp) * scale - kl)


# --------------------------------- driver ----------------------------------

if __name__ == "__main__":
    key = jax.random.PRNGKey(0)
    kx, ky, kz, kq, ks = jax.random.split(key, 5)

    N, D, M = 16, 4, 8          # data points, input dim, inducing points
    num_obs = 64

    X = jax.random.normal(kx, (N, D), dtype=jnp.float32)
    Y = jax.random.normal(ky, (N,), dtype=jnp.float32)

    # --- module parameters (deterministic, shapes per SVGP.__init__) ---
    lengthscale = jnp.asarray([1.0, 0.8, 1.2, 0.9], dtype=jnp.float32)
    variance = 1.5
    # inducing_variable (M, D): module inits to ones (singular kuu); emulate
    # a deterministic set_inducing_variable() call instead.
    Z = jax.random.normal(kz, (M, D), dtype=jnp.float32)
    # noise var: PositiveVariable(0.01, lower=1e-5) -> transform returns 0.01
    noise_lower = 1e-5
    x0 = 0.01 - noise_lower
    raw_noise = x0 + np.log(-np.expm1(-x0))
    noise_var = float(noise_lower + np.log1p(np.exp(raw_noise)))
    # q_mu (M,1) / q_sqrt (M,M): module inits zeros / eye; use deterministic
    # perturbations so every code path is exercised non-trivially.
    q_mu = 0.1 * jax.random.normal(kq, (M, 1), dtype=jnp.float32)
    q_sqrt = (jnp.eye(M, dtype=jnp.float32)
              + 0.05 * jnp.tril(jax.random.normal(ks, (M, M), dtype=jnp.float32)))

    neg_elbo = svgp_neg_elbo(X, Y, Z=Z, lengthscale=lengthscale,
                             variance=variance, noise_var=noise_var,
                             q_mu=q_mu, q_sqrt=q_sqrt, num_obs=num_obs)
    neg_elbo = jax.block_until_ready(neg_elbo)

    ref = ref_neg_elbo(X, Y, Z=Z, lengthscale=lengthscale, variance=variance,
                       noise_var=noise_var, q_mu=q_mu, q_sqrt=q_sqrt,
                       num_obs=num_obs)
    ref = jax.block_until_ready(ref)

    np.testing.assert_allclose(np.asarray(neg_elbo), np.asarray(ref),
                               rtol=1e-3, atol=1e-3)
    print("KERNEL_OK")
</pallas_src>

<mosaic_0001>
module attributes {stable_mosaic.version = 11 : i64} {
  func.func @_kuu_kernel(%arg0: memref<8x4xf32, #tpu.memory_space<vmem>>, %arg1: memref<8x1xf32, #tpu.memory_space<vmem>>, %arg2: memref<1x8xf32, #tpu.memory_space<vmem>>, %arg3: memref<1xf32, #tpu.memory_space<smem>>, %arg4: memref<8x8xf32, #tpu.memory_space<vmem>>) attributes {dimension_semantics = [], scalar_prefetch = 0 : i64, scratch_operands = 0 : i64, tpu.core_type = #tpu.core_type<tc>} {
    %c0 = arith.constant 0 : index
    %c0_0 = arith.constant 0 : index
    %0 = vector.load %arg0[%c0, %c0_0] : memref<8x4xf32, #tpu.memory_space<vmem>>, vector<8x4xf32>
    %cst = arith.constant dense<0.000000e+00> : vector<8x8xf32>
    %1 = tpu.matmul %0, %0, %cst {dimension_numbers = #tpu.dot_dimension_numbers<[1], [1], [0], [0], [0, 0, 1, 0], [], []>} : vector<8x4xf32>, vector<8x4xf32>, vector<8x8xf32> -> vector<8x8xf32>
    %c0_1 = arith.constant 0 : index
    %c0_2 = arith.constant 0 : index
    %2 = vector.load %arg1[%c0_1, %c0_2] : memref<8x1xf32, #tpu.memory_space<vmem>>, vector<8x1xf32>
    %c0_3 = arith.constant 0 : index
    %c0_4 = arith.constant 0 : index
    %3 = vector.load %arg2[%c0_3, %c0_4] : memref<1x8xf32, #tpu.memory_space<vmem>>, vector<1x8xf32>
    %4 = vector.broadcast %2 : vector<8x1xf32> to vector<8x8xf32>
    %5 = vector.broadcast %3 : vector<1x8xf32> to vector<8x8xf32>
    %6 = arith.addf %4, %5 : vector<8x8xf32>
    %cst_5 = arith.constant 2.000000e+00 : f32
    %7 = vector.broadcast %cst_5 : f32 to vector<8x8xf32>
    %8 = arith.mulf %7, %1 : vector<8x8xf32>
    %9 = arith.subf %6, %8 : vector<8x8xf32>
    %cst_6 = arith.constant 0.000000e+00 : f32
    %10 = vector.broadcast %cst_6 : f32 to vector<8x8xf32>
    %11 = arith.maximumf %9, %10 : vector<8x8xf32>
    %c0_7 = arith.constant 0 : index
    %12 = memref.load %arg3[%c0_7] : memref<1xf32, #tpu.memory_space<smem>>
    %cst_8 = arith.constant -5.000000e-01 : f32
    %13 = vector.broadcast %cst_8 : f32 to vector<8x8xf32>
    %14 = arith.mulf %13, %11 : vector<8x8xf32>
    %15 = math.exp %14 : vector<8x8xf32>
    %16 = vector.broadcast %12 : f32 to vector<8x8xf32>
    %17 = arith.mulf %16, %15 : vector<8x8xf32>
    %c0_9 = arith.constant 0 : index
    %c0_10 = arith.constant 0 : index
    %18 = vector.load %arg4[%c0_9, %c0_10] : memref<8x8xf32, #tpu.memory_space<vmem>>, vector<8x8xf32>
    tpu.vector_store %arg4[%c0_9, %c0_10], %17 {strides = array<i32>} : memref<8x8xf32, #tpu.memory_space<vmem>>, vector<8x8xf32>,
    return
  }
}

</mosaic_0001>

<bundles_post_ra>
// kernel: tpu_custom_call.1
= control target key start
LH: loop header
LB: loop body
LE: loop exit
PB: predicated region body
PF: predicated region fallthrough
CT: control target
= control target key end

     0   :  { %vm20_vm0 = vcmask 31744   ;;  %v174_v2 = vmov 0.0   ;;  %vm175_vm1 = vmmov 0   ;;  %s227_s0 = inlined_call_operand.vmem [shape: f32[8,4], index: 0, kind: input, shape index: {}]   ;;  %s228_s1 = inlined_call_operand.vmem [shape: f32[8,1], index: 1, kind: input, shape index: {}]   ;;  %s229_s2 = inlined_call_operand.vmem [shape: f32[1,8], index: 2, kind: input, shape index: {}]   ;;  %s230_s3 = inlined_call_operand.<no memory space> [shape: f32[1], index: 3, kind: input, shape index: {}]   ;;  %s231_s4 = inlined_call_operand.hbm [shape: f32[8,8], index: 4, kind: output, shape index: {}]  }
   0x1   :  { %v19_v0 = vld [vmem:[%s227_s0] sm:$0xff]  ;;  %138 = vmatprep.subr.mxu0 %v174_v2  ;;  %140 = vmatprep.mubr.msk.f32.mxu0 %vm175_vm1, %v174_v2 }
   0x2   :  { %v94_v1 = vld [vmem:[%s228_s1] sm:$0xff] }
   0x3   :  { %10 = vsyncpa [#allocation4], 0  ;;  %139 = vmatpush3.xpose.msk.msra.mxu0 %vm20_vm0, %v19_v0  ;;  %v176_v3 = vmov 0   ;;  %v135_v4 = vld [vmem:[%s229_s2] ss:$0 sm:$0xff]  ;;  %v115_v14 = vstv %s230_s3  ;;  %s177_s21 = smov [#allocation3]  }
   0x4   :  { %147 = vset.pattern.permute.xlu0 %v176_v3  ;;  %s125_s22 = sshll.u32 %s177_s21, 4  ;;  %vm117_vm2 = vcmask 64512   ;;  %s126_s22 = int_to_ptr.vmem [resolvable:$true] %s125_s22 }
   0x5   :  { %98 = vperm.xlu0 %147, %v94_v1   ;;  %s150_s2 = scalar_lea.vmem %s126_s22, 128  ;;  %p155_p1 = scmp.lt.s32.totalorder %s126_s22, %s126_s22 }
   0x6   :  { %141 = vmatmul.mubr.msk.f32.vlgmr.msra.gmra.mrb[0].mxu0 %vm20_vm0, %v19_v0  ;;  %p151_p0 = scmp.ne.s32.totalorder %s126_s22, %s150_s2  ;;  %p156_p2 = scmp.lt.s32.totalorder %s150_s2, %s150_s2 }
   0x8   :  { %p157_p3 = por %p156_p2, %p155_p1 }
   0xa   :  { %p158_p4 = pnand %p157_p3, %p151_p0 }
  0x84   :  { %v99_v5 = vpop.permute.xlu0 %98 }
  0x85   :  { %v107_v6 = vadd.f32 %v135_v4, %v99_v5 }
  0xd9   :  { %v90_v7 = vpop.f32.mrb[0].mxu0 }
  0xda   :  { %v108_v8 = vmul.f32 2.0, %v90_v7  ;;  %v142_v9 = vpop.f32.mrb[1].mxu0 }
  0xdc   :  { %v109_v10 = vsub.f32 %v107_v6, %v108_v8 }
  0xde   :  { %v110_v11 = vmax.f32 %v109_v10, 0.0 }
  0xe0   :  { %v112_v12 = vmul.f32 -0.5, %v110_v11 }
  0xe2   :  { %v113_v13 = vmul.f32 1.442695, %v112_v12 }
  0xe4   :  { %148 = vpow2.f32 %v113_v13 }
  0xee   :  { %v149_v15 = vpop.eup %148 }
  0xef   :  { %v116_v16 = vmul.f32 %v149_v15, %v115_v14 }
  0xf1   :  { %118 = vst.msk [vmem:[#allocation3] sm:$0xff] %vm117_vm2, %v116_v16 }
  0xf2   :  { %161 = shalt.err (!%p158_p4)
}
  0xf3   :  { %s162_s25 = scalar_lea.hbm %s231_s4, 128 }
  0xf4   :  { %p163_p5 = scmp.ne.s32.totalorder %s231_s4, %s162_s25  ;;  %p166_p6 = scmp.lt.u32.totalorder %s162_s25, %s231_s4 }
  0xf6   :  { %p168_p7 = pnand %p166_p6, %p163_p5 }
  0xf8   :  { %171 = shalt.err (!%p168_p7)
}
  0xf9   :  { %128 = dma.vmem_to_hbm [thread:$0]  %s126_s22, 128, %s231_s4, [#allocation4]  }
  0xfa   :  { %172 = dma.done.wait [#allocation4], 128  }
  0xfb   :  { %173 = vsyncadd [#allocation4], 4294967168 }
  0xfc   :  { %132 = vsyncpa [#allocation4], 1 }

</bundles_post_ra>
